<compile_context>
chip_gen: v5e
topology: v5e:2x2
jax: 0.10.0
libtpu: 0.0.40
codegen_flags: <defaults>
</compile_context>

<pallas_src>
import math

import jax
import jax.numpy as jnp
import numpy as np
from jax.experimental import pallas as pl
from jax.experimental.pallas import tpu as pltpu


def _pe_kernel(sel_ref, tab_ref, coords_ref, out_ref):
    """Computes one (tile_rows, lane) output tile.

    sel_ref:    (2*fold, lane) f32 constant 0/1 selection matrix (src row -> lane).
    tab_ref:    (2, lane) f32 -- row 0 = frequency, row 1 = phase (0 or pi/2).
    coords_ref: (2*fold, tile_rows) f32, point-groups along lanes (lane-dense DMA).
    out_ref:    (tile_rows, lane) output tile.
    """
    ct = coords_ref[...]                                      # (2*fold, TR)
    # Small XLU transpose of the coords tile (it is ~zdim/2x smaller than the
    # output tile), then a constant selection matmul on the otherwise-idle MXU
    # broadcasts each coordinate into its lane segments.  HIGHEST precision so
    # the f32 coordinates are not rounded to bf16 by the MXU passes.
    pos = jnp.dot(ct.T, sel_ref[...],
                  precision=jax.lax.Precision.HIGHEST,
                  preferred_element_type=jnp.float32)         # (TR, lane)
    freq = tab_ref[0:1, :]                                    # (1, lane)
    phase = tab_ref[1:2, :]                                   # (1, lane)
    # cos(t) = sin(t + pi/2): one transcendental per output element.
    out_ref[...] = jnp.sin(pos * freq + phase).astype(out_ref.dtype)


def _make_tables(zdim: int, fold: int):
    """Grid-invariant lane tables, hoisted out of the kernel (computed once)."""
    lane = fold * zdim
    j = np.arange(lane)
    m = j % zdim                  # encoding slot within one point
    g = j // zdim                 # point index within the folded group
    k = m // 4                    # frequency index
    c = (m % 4) // 2              # 0 -> x coordinate, 1 -> y coordinate
    is_cos = m % 2                # odd slots are cosine lanes
    src = 2 * g + c               # transposed-coords row holding the coordinate

    sel = np.zeros((2 * fold, lane), np.float32)
    sel[src, j] = 1.0                                                   # 0/1 matrix
    freq = np.exp(k * -(2.0 * np.log(10000.0) / (zdim // 2))).astype(np.float32)
    phase = (is_cos * (np.pi / 2.0)).astype(np.float32)
    tabs = np.stack([freq, phase]).astype(np.float32)                   # (2, lane)
    return jnp.asarray(sel), jnp.asarray(tabs)


def _pick_tile_rows(rows: int, lane: int, batch: int, *,
                    target_bytes: int = 4 * 1024 * 1024, min_steps: int = 8) -> int:
    """Row-tile size: a multiple of 128 (or the full extent when rows <= 128).

    Big enough that the ~0.35us per-step overhead is amortized (multi-MiB f32
    tiles), small enough that (a) double-buffered tiles stay well inside the
    scoped-VMEM budget on all generations (incl. v7x's 64 MiB) and (b) the grid
    keeps >= ~min_steps steps so both v7x TensorCores stay busy.
    """
    if rows <= 128:
        return rows
    row_bytes = lane * 4
    cap_bytes = max(128, (target_bytes // row_bytes) // 128 * 128)
    per_batch_steps = max(1, min_steps // max(batch, 1))
    cap_steps = max(128, (rows // per_batch_steps) // 128 * 128)
    full = (rows // 128) * 128
    return max(128, min(cap_bytes, cap_steps, full))


def sine_cosine_positional_encoding(coords, zdim, *, tile_rows=None,
                                    out_dtype=jnp.float32):
    """coords: (B, N, 2) -> (B, N, zdim), matching the PyTorch module."""
    assert zdim % 4 == 0, "zdim must be a multiple of 4 for 2D positional encoding."
    B, N, two = coords.shape
    assert two == 2, "coords must have shape (batch, num_points, 2)"
    coords = coords.astype(jnp.float32)

    # Lane folding: pack `fold` points per kernel row so the output's last dim
    # is a multiple of 128 lanes for any zdim that is a multiple of 4.
    fold = 128 // math.gcd(zdim, 128)
    lane = fold * zdim

    # Pad N up to a multiple of fold (surfaced + handled instead of silently
    # degrading to masked stores); padded rows are sliced off after the call.
    n_pad = (-N) % fold
    if n_pad:
        coords = jnp.pad(coords, ((0, 0), (0, n_pad), (0, 0)))
    n_total = N + n_pad
    rows = n_total // fold

    if tile_rows is None:
        tile_rows = _pick_tile_rows(rows, lane, B)
    assert tile_rows == rows or tile_rows % 128 == 0, (
        "tile_rows must be a multiple of 128 (or the full row extent)")

    # Lane-dense input layout: (B, 2*fold, rows) -- coords_t[b, 2g+c, q] is
    # coordinate c of point q*fold+g.  A tiny XLA transpose of the (small)
    # coords array, done once outside the kernel.
    coords_t = jnp.transpose(coords.reshape(B, rows, fold, 2),
                             (0, 2, 3, 1)).reshape(B, 2 * fold, rows)

    sel, tabs = _make_tables(zdim, fold)

    grid = (B, pl.cdiv(rows, tile_rows))

    out = pl.pallas_call(
        _pe_kernel,
        out_shape=jax.ShapeDtypeStruct((B, rows, lane), out_dtype),
        grid_spec=pltpu.PrefetchScalarGridSpec(
            num_scalar_prefetch=0,
            grid=grid,
            in_specs=[
                # Constant tables: constant index_map -> DMA'd once, kept resident.
                pl.BlockSpec((2 * fold, lane), lambda b, i: (0, 0)),
                pl.BlockSpec((2, lane), lambda b, i: (0, 0)),
                # Lane-dense coords tile: long (rows) axis on lanes.
                pl.BlockSpec((None, 2 * fold, tile_rows), lambda b, i: (b, 0, i)),
            ],
            out_specs=pl.BlockSpec((None, tile_rows, lane), lambda b, i: (b, i, 0)),
        ),
        compiler_params=pltpu.CompilerParams(
            dimension_semantics=("parallel", "parallel"),
            vmem_limit_bytes=32 * 1024 * 1024,
        ),
    )(sel, tabs, coords_t)

    pe = out.reshape(B, n_total, zdim)     # contiguous view, free
    if n_pad:
        pe = pe[:, :N, :]                  # drop padded points
    return pe


def _reference(coords, zdim):
    """Pure-JAX mirror of the PyTorch forward, for verification."""
    B, N, _ = coords.shape
    div_term = jnp.exp(
        jnp.arange(0, zdim // 2, 2, dtype=jnp.float32)
        * -(jnp.log(10000.0) / (zdim // 2)))
    x = coords[:, :, 0:1]
    y = coords[:, :, 1:2]
    pe = jnp.zeros((B, N, zdim), dtype=jnp.float32)
    pe = pe.at[:, :, 0::4].set(jnp.sin(x * div_term))
    pe = pe.at[:, :, 1::4].set(jnp.cos(x * div_term))
    pe = pe.at[:, :, 2::4].set(jnp.sin(y * div_term))
    pe = pe.at[:, :, 3::4].set(jnp.cos(y * div_term))
    return pe


if __name__ == "__main__":
    root = jax.random.PRNGKey(0)
    k1, k2, k3 = jax.random.split(root, 3)

    # 1) Small shape matching the module convention: (B=2, N=16, zdim=32).
    coords = jax.random.uniform(k1, (2, 16, 2), dtype=jnp.float32) * 10.0
    out = jax.block_until_ready(sine_cosine_positional_encoding(coords, 32))
    ref = _reference(coords, 32)
    assert out.shape == (2, 16, 32)
    assert jnp.allclose(out, ref, atol=1e-5, rtol=1e-5)

    # 2) Multi-step grid with a ragged last row-tile (rows=200, tile_rows=128),
    #    exercising the pl.cdiv grid path.
    coords2 = jax.random.uniform(k2, (1, 800, 2), dtype=jnp.float32) * 10.0
    out2 = jax.block_until_ready(sine_cosine_positional_encoding(coords2, 32))
    ref2 = _reference(coords2, 32)
    assert out2.shape == (1, 800, 32)
    assert jnp.allclose(out2, ref2, atol=1e-5, rtol=1e-5)

    # 3) N not a multiple of the lane fold (padded internally, sliced off).
    coords3 = jax.random.uniform(k3, (1, 10, 2), dtype=jnp.float32) * 10.0
    out3 = jax.block_until_ready(sine_cosine_positional_encoding(coords3, 32))
    ref3 = _reference(coords3, 32)
    assert out3.shape == (1, 10, 32)
    assert jnp.allclose(out3, ref3, atol=1e-5, rtol=1e-5)

    print("KERNEL_OK")
</pallas_src>

<mosaic_0001>
module attributes {stable_mosaic.version = 11 : i64} {
  func.func @_pe_kernel(%arg0: i32, %arg1: i32, %arg2: memref<8x128xf32, #tpu.memory_space<vmem>>, %arg3: memref<2x128xf32, #tpu.memory_space<vmem>>, %arg4: memref<1x8x4xf32, #tpu.memory_space<vmem>>, %arg5: memref<1x4x128xf32, #tpu.memory_space<vmem>>) attributes {dimension_semantics = [#tpu.dimension_semantics<parallel>, #tpu.dimension_semantics<parallel>], iteration_bounds = array<i64: 2, 1>, scalar_prefetch = 0 : i64, scratch_operands = 0 : i64, tpu.core_type = #tpu.core_type<tc>, window_params = [{pipeline_mode = #tpu.pipeline_mode<synchronous>, transform_indices = @transform_0, window_bounds = array<i64: 8, 128>}, {pipeline_mode = #tpu.pipeline_mode<synchronous>, transform_indices = @transform_1, window_bounds = array<i64: 2, 128>}, {transform_indices = @transform_2, window_bounds = array<i64: 1, 8, 4>}, {transform_indices = @transform_3, window_bounds = array<i64: 1, 4, 128>}]} {
    %c0 = arith.constant 0 : index
    %c0_0 = arith.constant 0 : index
    %c0_1 = arith.constant 0 : index
    %0 = vector.load %arg4[%c0, %c0_0, %c0_1] : memref<1x8x4xf32, #tpu.memory_space<vmem>>, vector<1x8x4xf32>
    %1 = vector.shape_cast %0 : vector<1x8x4xf32> to vector<8x4xf32>
    %2 = tpu.transpose %1, [1, 0] : vector<8x4xf32> -> vector<4x8xf32>
    %c0_2 = arith.constant 0 : index
    %c0_3 = arith.constant 0 : index
    %3 = vector.load %arg2[%c0_2, %c0_3] : memref<8x128xf32, #tpu.memory_space<vmem>>, vector<8x128xf32>
    %cst = arith.constant dense<0.000000e+00> : vector<4x128xf32>
    %4 = tpu.matmul %2, %3, %cst {dimension_numbers = #tpu.dot_dimension_numbers<[1], [0], [0], [1], [0, 0, 1, 1], [], []>, precision = #tpu.contract_precision<fp32>} : vector<4x8xf32>, vector<8x128xf32>, vector<4x128xf32> -> vector<4x128xf32>
    %c0_4 = arith.constant 0 : index
    %c0_5 = arith.constant 0 : index
    %5 = vector.load %arg3[%c0_4, %c0_5] : memref<2x128xf32, #tpu.memory_space<vmem>>, vector<1x128xf32>
    %c1 = arith.constant 1 : index
    %c0_6 = arith.constant 0 : index
    %6 = vector.load %arg3[%c1, %c0_6] : memref<2x128xf32, #tpu.memory_space<vmem>>, vector<1x128xf32>
    %7 = vector.broadcast %5 : vector<1x128xf32> to vector<4x128xf32>
    %8 = arith.mulf %4, %7 : vector<4x128xf32>
    %9 = vector.broadcast %6 : vector<1x128xf32> to vector<4x128xf32>
    %10 = arith.addf %8, %9 : vector<4x128xf32>
    %11 = math.sin %10 : vector<4x128xf32>
    %c0_7 = arith.constant 0 : index
    %c0_8 = arith.constant 0 : index
    %c0_9 = arith.constant 0 : index
    %12 = vector.load %arg5[%c0_7, %c0_8, %c0_9] : memref<1x4x128xf32, #tpu.memory_space<vmem>>, vector<1x4x128xf32>
    %13 = vector.shape_cast %12 : vector<1x4x128xf32> to vector<4x128xf32>
    %14 = vector.shape_cast %11 : vector<4x128xf32> to vector<1x4x128xf32>
    tpu.vector_store %arg5[%c0_7, %c0_8, %c0_9], %14 {strides = array<i32>} : memref<1x4x128xf32, #tpu.memory_space<vmem>>, vector<1x4x128xf32>,
    return
  }
  func.func @transform_0(%arg0: i32, %arg1: i32) -> (i32, i32) {
    %c0_i32 = arith.constant 0 : i32
    %c0_i32_0 = arith.constant 0 : i32
    %c0_i32_1 = arith.constant 0 : i32
    return %c0_i32, %c0_i32_0 : i32, i32
  }
  func.func @transform_1(%arg0: i32, %arg1: i32) -> (i32, i32) {
    %c0_i32 = arith.constant 0 : i32
    %c0_i32_0 = arith.constant 0 : i32
    %c0_i32_1 = arith.constant 0 : i32
    return %c0_i32, %c0_i32_0 : i32, i32
  }
  func.func @transform_2(%arg0: i32, %arg1: i32) -> (i32, i32, i32) {
    %c0_i32 = arith.constant 0 : i32
    %c0_i32_0 = arith.constant 0 : i32
    return %arg0, %c0_i32, %arg1 : i32, i32, i32
  }
  func.func @transform_3(%arg0: i32, %arg1: i32) -> (i32, i32, i32) {
    %c0_i32 = arith.constant 0 : i32
    %c0_i32_0 = arith.constant 0 : i32
    return %arg0, %arg1, %c0_i32 : i32, i32, i32
  }
}

</mosaic_0001>

<bundles_post_ra>
// kernel: tpu_custom_call.1
= control target key start
LH: loop header
LB: loop body
LE: loop exit
PB: predicated region body
PF: predicated region fallthrough
CT: control target
= control target key end

     0   :  { %8 = vsyncpa [#allocation3], 0  ;;  %s981_s0 = inlined_call_operand.vmem [shape: f32[8,128], index: 0, kind: input, shape index: {}]   ;;  %s982_s1 = inlined_call_operand.vmem [shape: f32[2,128], index: 1, kind: input, shape index: {}]   ;;  %s983_s2 = inlined_call_operand.vmem [shape: f32[2,8,4], index: 2, kind: input, shape index: {}]   ;;  %s984_s3 = inlined_call_operand.hbm [shape: f32[2,4,128], index: 3, kind: output, shape index: {}]  }
   0x1   :  { %10 = vsyncpa [#allocation3 + $0x1], 0  ;;  %s811_s12 = smov 0   ;;  %s813_s13 = smov 0  }
   0x2   :  { %s815_s14 = smov 0   ;;  %s817_s15 = smov 0  }
   0x3   :  { %s819_s16 = smov 0   ;;  %s821_s17 = smov 0  }
   0x4 LB: > { %s625_s18 = sadd.s32 4294967295, %s782_s17   ;;  %s626_s19 = sadd.s32 4294967294, %s782_s17   ;;  %s782_s17 = sphi %s821_s17, %s16_s17   ;;  %s778_s16 = sphi %s819_s16, %s993_s16   ;;  %s774_s15 = sphi %s817_s15, %s992_s15   ;;  %s770_s14 = sphi %s815_s14, %s991_s14   ;;  %s766_s13 = sphi %s813_s13, %s990_s13   ;;  %s762_s12 = sphi %s811_s12, %s989_s12  }
   0x5   : > { %s28_s20 = sadd.s32 1, %s778_s16  ;;  %s107_s21 = sadd.s32 1, %s770_s14 }
   0x6   : > { %p30_p0 = scmp.ge.s32.totalorder %s28_s20, 2  ;;  %p117_p1 = scmp.ne.s32.totalorder %s770_s14, %s766_s13 }
   0x7   : > { %p118_p2 = scmp.eq.s32.totalorder %s625_s18, 1  ;;  %p123_p3 = scmp.ne.s32.totalorder %s766_s13, %s762_s12 }
   0x8   : > { %s995_s20 = smov (%p30_p0, %s28_s20), 0  ;;  %p124_p5 = scmp.eq.s32.totalorder %s626_s19, 1 }
   0x9   : > { %p851_p4 = por %p118_p2, %p117_p1  ;;  %s102_s23 = ssub.s32 %s778_s16, %s995_s20 }
   0xa   : > { %p629_p6 = scmp.ge.s32.totalorder %s782_s17, 1  ;;  %p105_p7 = scmp.eq.s32.totalorder %s102_s23, 0 }
   0xb   : > { %p858_p8 = por %p124_p5, %p123_p3  ;;  %p158_p9 = scmp.lt.s32.totalorder %s782_s17, 3 }
   0xc   : > { %s864_s25 = scalar_select %p105_p7, %s770_s14, %s107_s21  }
   0xd   : > { %p159_p10 = pnand %p629_p6, %p158_p9 }
   0xe   : > { %p184_p11 = scmp.lt.s32.totalorder (!%p159_p10), %s774_s15, 1  ;;  %s181_s10 = sand.u32 (!%p159_p10), 1, %s766_s13  }
   0xf   : > { %162 = sbr.rel (%p159_p10) target bundleno = 442 (0x1ba), region = 32  ;;  %s630_s11 = sshll.u32 (!%p159_p10), %s181_s10, 2 }
  0x10   : > { %s636_s18 = sshll.u32 (!%p159_p10), %s774_s15, 2  ;;  %s724_s6 = scalar_lea.hbm (!%p159_p10), %s984_s3, 8 }
  0x11   : > { %s549_s23 = scalar_lea.hbm (!%p159_p10), %s984_s3, %s636_s18 }
  0x12   : > { %s553_s28 = sshll.u32 (!%p159_p10), %s549_s23, 4  ;;  %s554_s28 = int_to_ptr.hbm [resolvable:$true] %s553_s28 }
  0x13   : > { %s718_s29 = sshra.s32 (!%p159_p10), %s554_s28, 4  ;;  %s719_s29 = int_to_ptr.hbm [resolvable:$true] %s718_s29 }
  0x14   : > { %s185_s26 = scalar_select %p184_p11, %s774_s15, 1  ;;  %v224_v1 = vld [vmem:[%s981_s0] sm:$0xff]  ;;  %vm225_vm0 = vcmask 64512   ;;  %v784_v40 = vmov 683565275  }
  0x15   : > { %v244_v2 = vand.u32 4294901760, %v224_v1  ;;  %v702_v23 = vld [vmem:[%s982_s1] ss:$0 sm:$0xff]  ;;  %v703_v26 = vld [vmem:[%s982_s1 + $0x1] ss:$0 sm:$0xff]  ;;  %s538_s15 = scalar_lea.sflag [#allocation3], %s181_s10  ;;  %p725_p1 = scmp.lt.s32.totalorder %s719_s29, %s984_s3 }
  0x16   : > { %s631_s27 = sshll.u32 %s185_s26, 3  ;;  %v785_v42 = vmov 2475754826   ;;  %v786_v45 = vmov 2131351028   ;;  %s183_s26 = scalar_lea.vmem [#allocation2], %s630_s11 }
  0x17   : > { %s190_s30 = scalar_lea.vmem %s983_s2, %s631_s27  ;;  %v271_v3 = vsub.f32 %v224_v1, %v244_v2  ;;  %321 = vmatpush.msra.mxu3 %v244_v2  ;;  %245 = vmatpush.msra.mxu0 %v244_v2  ;;  %v787_v48 = vmov 2102212464   ;;  %v788_v51 = vmov 920167782   ;;  %v789_v54 = vmov 1326507024  }
  0x18   : > { %v191_v0 = vld [vmem:[%s190_s30] sm:$0xff]  ;;  %s551_s27 = sshll.u32 %s183_s26, 4  ;;  %s720_s30 = scalar_lea.hbm %s719_s29, 4  ;;  %s552_s27 = int_to_ptr.vmem [resolvable:$true] %s551_s27 }
  0x19   : > { %192 = vxpose.xlu0.b32.start.end [1/1] (short) (narrow) %v191_v0, 8  ;;  %v272_v4 = vand.u32 4294901760, %v271_v3  ;;  %298 = vmatpush.msra.mxu2 %v271_v3  ;;  %p721_p12 = scmp.ne.s32.totalorder %s719_s29, %s720_s30  ;;  %p726_p2 = scmp.lt.s32.totalorder %s724_s6, %s720_s30 }
  0x1b   : > { %v273_v5 = vsub.f32 %v271_v3, %v272_v4  ;;  %347 = vmatpush.msrb.mxu0 %v272_v4  ;;  %p722_p13 = pnand %p721_p12, %p851_p4  ;;  %p727_p3 = por %p726_p2, %p725_p1 }
  0x1d   : > { %v274_v6 = vand.u32 4294901760, %v273_v5  ;;  %p723_p0 = pneg %p722_p13 }
  0x1f   : > { %275 = vmatpush.msra.mxu1 %v274_v6  ;;  %p728_p5 = pnand %p727_p3, %p723_p0 }
  0x21   : > { %369 = vmatpush.msrb.mxu1 %v244_v2 }
  0xbd   : > { %v208_v7 = vpop.trf.xlu0 }
  0xbe   : > { %v227_v8 = vsel %vm225_vm0, %v208_v7, 0 }
  0xbf   : > { %v246_v9 = vand.u32 4294901760, %v227_v8 }
  0xc1   : > { %v247_v10 = vsub.f32 %v227_v8, %v246_v9  ;;  %277 = vmatmul.f32.vlgmr.msra.gmra.mxu1 %v246_v9 }
  0xc3   : > { %301 = vmatmul.f32.vlgmr.msra.gmra.mxu2 %v247_v10  ;;  %v248_v11 = vand.u32 4294901760, %v247_v10 }
  0xc5   : > { %325 = vmatmul.f32.vlgmr.msra.gmra.mxu3 %v248_v11  ;;  %v249_v12 = vsub.f32 %v247_v10, %v248_v11 }
  0xc7   : > { %v250_v13 = vand.u32 4294901760, %v249_v12 }
  0xc9   : > { %251 = vmatmul.f32.vlgmr.msra.gmra.mxu0 %v250_v13  ;;  %371 = vmatmul.f32.vlgmr.msrb.gmra.mxu1 %v246_v9 }
  0xd1   : > { %349 = vmatmul.f32.vlgmr.msrb.gmra.mxu0 %v246_v9 }
 0x13e   : > { %v278_v14 = vpop.f32.mrf.mxu1 }
 0x146   : > { %v252_v15 = vpop.f32.mrf.mxu0  ;;  %v302_v17 = vpop.f32.mrf.mxu2 }
 0x147   : > { %v279_v16 = vadd.f32 %v278_v14, %v252_v15  ;;  %v372_v24 = vpop.f32.mrf.mxu1 }
 0x148   : > { %v326_v19 = vpop.f32.mrf.mxu3 }
 0x149   : > { %v303_v18 = vadd.f32 %v302_v17, %v279_v16 }
 0x14b   : > { %v327_v20 = vadd.f32 %v326_v19, %v303_v18 }
 0x14e   : > { %v350_v21 = vpop.f32.mrf.mxu0 }
 0x14f   : > { %v351_v22 = vadd.f32 %v350_v21, %v327_v20 }
 0x151   : > { %v373_v25 = vadd.f32 %v372_v24, %v351_v22  ;;  %v790_v24 = vmov 0  }
 0x153   : > { %v378_v27 = vmul.f32 %v702_v23, %v373_v25 }
 0x155   : > { %v880_v28 = vadd.f32 %v703_v26, %v378_v27 }
 0x157   : > { %v384_v29 = vand.u32 2139095040, %v880_v28  ;;  %v381_v32 = vand.u32 2147483647, %v880_v28  ;;  %vm383_vm13 = vcmp.lt.s32.totalorder %v880_v28, 0 }
 0x159   : > { %v385_v30 = vshrl.u32 %v384_v29, 23  ;;  %v388_v35 = vand.u32 8388607, %v381_v32  ;;  %vm934_vm14 = vcmp.le.f32.partialorder %v381_v32, 0.7853982 }
 0x15b   : > { %v632_v31 = vadd.s32 4294967169, %v385_v30  ;;  %v389_v39 = vor.u32 8388608, %v388_v35 }
 0x15d   : > { %v391_v33 = vadd.s32 1, %v632_v31  ;;  %v897_v61 = vshll.u32 %v389_v39, 8 }
 0x15f   : > { %vm392_vm1 = vcmp.gt.s32.totalorder %v391_v33, 0  ;;  %v430_v6 = vand.u32 65535, %v897_v61  ;;  %v431_v7 = vshrl.u32 %v897_v61, 16 }
 0x160   : > { %v393_v34 = vsel %vm392_vm1, %v391_v33, 0 }
 0x161   : > { %v395_v36 = vand.u32 31, %v393_v34  ;;  %v888_v38 = vshrl.u32 %v393_v34, 5 }
 0x163   : > { %v886_v37 = vsub.s32 32, %v395_v36  ;;  %v398_v41 = vshll.u32 %v784_v40, %v395_v36  ;;  %v401_v43 = vshll.u32 %v785_v42, %v395_v36  ;;  %v404_v47 = vshll.u32 %v786_v45, %v395_v36 }
 0x164   : > { %v407_v50 = vshll.u32 %v787_v48, %v395_v36  ;;  %v410_v53 = vshll.u32 %v788_v51, %v395_v36  ;;  %vm413_vm2 = vcmp.lt.s32.totalorder %v888_v38, 1  ;;  %vm416_vm3 = vcmp.lt.s32.totalorder %v888_v38, 4 }
 0x165   : > { %v399_v44 = vshrl.u32 %v785_v42, %v886_v37  ;;  %v402_v46 = vshrl.u32 %v786_v45, %v886_v37  ;;  %v405_v49 = vshrl.u32 %v787_v48, %v886_v37  ;;  %v408_v52 = vshrl.u32 %v788_v51, %v886_v37 }
 0x166   : > { %v411_v55 = vshrl.u32 %v789_v54, %v886_v37  ;;  %vm415_vm4 = vcmp.lt.s32.totalorder %v888_v38, 3  ;;  %vm414_vm5 = vcmp.lt.s32.totalorder %v888_v38, 2  ;;  %v397_v35 = vshrl.u32 %v784_v40, %v886_v37 }
 0x167   : > { %v400_v56 = vor.u32 %v399_v44, %v398_v41  ;;  %v403_v57 = vor.u32 %v402_v46, %v401_v43  ;;  %v406_v58 = vor.u32 %v405_v49, %v404_v47  ;;  %v409_v59 = vor.u32 %v408_v52, %v407_v50 }
 0x168   : > { %v412_v60 = vor.u32 %v411_v55, %v410_v53 }
 0x169   : > { %v421_v62 = vsel %vm413_vm2, %v400_v56, %v403_v57  ;;  %v425_v63 = vsel %vm413_vm2, %v403_v57, %v406_v58  ;;  %v422_v0 = vsel %vm416_vm3, %v409_v59, 920167782  ;;  %v418_v31 = vsel %vm416_vm3, %v406_v58, 2102212464 }
 0x16a   : > { %v426_v1 = vsel %vm416_vm3, %v412_v60, 1326507024  ;;  %v423_v2 = vsel %vm415_vm4, %v406_v58, %v422_v0  ;;  %v417_v44 = vsel %vm413_vm2, %v397_v35, %v400_v56  ;;  %v419_v45 = vsel %vm415_vm4, %v403_v57, %v418_v31 }
 0x16b   : > { %v427_v3 = vsel %vm415_vm4, %v409_v59, %v426_v1  ;;  %v424_v4 = vsel %vm414_vm5, %v421_v62, %v423_v2  ;;  %v420_v37 = vsel %vm414_vm5, %v417_v44, %v419_v45  ;;  %vm524_vm2 = vweird.f32 %v880_v28 }
 0x16c   : > { %v428_v5 = vsel %vm414_vm5, %v425_v63, %v427_v3  ;;  %v454_v10 = vand.u32 65535, %v424_v4  ;;  %v455_v11 = vshrl.u32 %v424_v4, 16  ;;  %v474_v53 = vmul.u32 %v897_v61, %v420_v37 }
 0x16d   : > { %v432_v8 = vand.u32 65535, %v428_v5  ;;  %v433_v9 = vshrl.u32 %v428_v5, 16 }
 0x16e   : > { %v457_v14 = vmul.u32 %v455_v11, %v430_v6  ;;  %v458_v15 = vmul.u32 %v454_v10, %v431_v7  ;;  %v456_v19 = vmul.u32 %v454_v10, %v430_v6  ;;  %v459_v23 = vmul.u32 %v455_v11, %v431_v7 }
 0x16f   : > { %v435_v12 = vmul.u32 %v433_v9, %v430_v6  ;;  %v436_v13 = vmul.u32 %v432_v8, %v431_v7  ;;  %v434_v16 = vmul.u32 %v432_v8, %v430_v6  ;;  %v437_v18 = vmul.u32 %v433_v9, %v431_v7 }
 0x170   : > { %v460_v20 = vshll.u32 %v457_v14, 16  ;;  %v462_v26 = vshll.u32 %v458_v15, 16  ;;  %v461_v42 = vshrl.u32 %v457_v14, 16  ;;  %v463_v48 = vshrl.u32 %v458_v15, 16 }
 0x171   : > { %v438_v17 = vshll.u32 %v435_v12, 16  ;;  %v440_v21 = vshll.u32 %v436_v13, 16  ;;  %v439_v36 = vshrl.u32 %v435_v12, 16  ;;  %v441_v46 = vshrl.u32 %v436_v13, 16 }
 0x172   : > { %vm464_vm7 = vc.u32 %v456_v19, %v460_v20  ;;  %v466_v27 = vadd.s32 %v460_v20, %v456_v19 }
 0x173   : > { %vm442_vm6 = vc.u32 %v434_v16, %v438_v17  ;;  %v444_v22 = vadd.s32 %v438_v17, %v434_v16  ;;  %v465_v30 = vsel %vm464_vm7, 1, %v790_v24 }
 0x174   : > { %v443_v25 = vsel %vm442_vm6, 1, %v790_v24  ;;  %v467_v34 = vadd.s32 %v465_v30, %v459_v23  ;;  %vm468_vm9 = vc.u32 %v466_v27, %v462_v26  ;;  %v470_v51 = vadd.s32 %v466_v27, %v462_v26 }
 0x175   : > { %v445_v29 = vadd.s32 %v443_v25, %v437_v18  ;;  %vm446_vm8 = vc.u32 %v444_v22, %v440_v21  ;;  %v469_v41 = vsel %vm468_vm9, 1, %v790_v24 }
 0x176   : > { %v447_v33 = vsel %vm446_vm8, 1, %v790_v24  ;;  %v471_v43 = vadd.s32 %v469_v41, %v467_v34 }
 0x177   : > { %v449_v39 = vadd.s32 %v447_v33, %v445_v29 }
 0x178   : > { %v472_v49 = vadd.s32 %v471_v43, %v461_v42 }
 0x179   : > { %v450_v47 = vadd.s32 %v449_v39, %v439_v36 }
 0x17a   : > { %v473_v40 = vadd.s32 %v472_v49, %v463_v48 }
 0x17b   : > { %v451_v50 = vadd.s32 %v450_v47, %v441_v46 }
 0x17c   : > { %v477_v52 = vadd.s32 1, %v473_v40 }
 0x17d   : > { %vm476_vm10 = vc.u32 %v451_v50, %v470_v51  ;;  %v475_v38 = vadd.s32 %v470_v51, %v451_v50 }
 0x17e   : > { %v478_v54 = vsel %vm476_vm10, %v477_v52, %v473_v40 }
 0x17f   : > { %v479_v55 = vadd.s32 %v478_v54, %v474_v53 }
 0x181   : > { %v480_v56 = vadd.s32 536870912, %v479_v55 }
 0x183   : > { %v481_v58 = vshrl.u32 %v480_v56, 30 }
 0x185   : > { %v482_v59 = vshll.u32 %v481_v58, 30  ;;  %v505_v15 = vsub.s32 4, %v481_v58 }
 0x187   : > { %v483_v57 = vsub.s32 %v479_v55, %v482_v59  ;;  %v506_v20 = vsel %vm383_vm13, %v505_v15, %v481_v58 }
 0x188   : > { %v508_v23 = vsel %vm934_vm14, 0, %v506_v20 }
 0x189   : > { %vm484_vm11 = vcmp.lt.s32.totalorder %v483_v57, 0  ;;  %v485_v60 = vsub.s32 0, %v483_v57  ;;  %v525_v27 = vadd.s32 3, %v508_v23 }
 0x18b   : > { %v486_v62 = vsel %vm484_vm11, %v485_v60, %v483_v57  ;;  %v526_v34 = vand.u32 3, %v525_v27 }
 0x18c   : > { %v487_v63 = vclz %v486_v62 }
 0x18d   : > { %vm528_vm15 = vcmp.eq.s32.totalorder %v526_v34, 0  ;;  %vm531_vm0 = vcmp.eq.s32.totalorder %v526_v34, 2  ;;  %vm527_vm1 = vcmp.lt.s32.totalorder %v526_v34, 2 }
 0x18e   : > { %v633_v0 = vadd.s32 4294967294, %v487_v63 }
 0x190   : > { %vm634_vm12 = vcmp.lt.s32.totalorder %v633_v0, 0 }
 0x191   : > { %v490_v1 = vsel %vm634_vm12, 0, %v633_v0 }
 0x192   : > { %v491_v2 = vsub.s32 32, %v490_v1  ;;  %v495_v3 = vsub.s32 4294967266, %v490_v1  ;;  %v492_v4 = vshll.u32 %v483_v57, %v490_v1 }
 0x194   : > { %v493_v5 = vshrl.u32 %v475_v38, %v491_v2  ;;  %v496_v6 = vadd.s32 127, %v495_v3 }
 0x196   : > { %v494_v61 = vor.u32 %v493_v5, %v492_v4  ;;  %v497_v7 = vshll.u32 %v496_v6, 23 }
 0x198   : > { %v498_v8 = vor.u32 4788187, %v497_v7  ;;  %v501_v10 = vcvt.s32.f32 %v494_v61 }
 0x19a   : > { %v499_v9 = vand.u32 2147483647, %v498_v8 }
 0x19c   : > { %v502_v11 = vmul.f32 %v501_v10, %v499_v9 }
 0x19e   : > { %v503_v12 = vxor.u32 2147483648, %v502_v11 }
 0x1a0   : > { %v504_v14 = vsel %vm383_vm13, %v503_v12, %v502_v11 }
 0x1a1   : > { %v507_v16 = vsel %vm934_vm14, %v880_v28, %v504_v14 }
 0x1a2   : > { %v509_v17 = vmul.f32 %v507_v16, %v507_v16 }
 0x1a4   : > { %v510_v18 = vmul.f32 -0.001358992, %v509_v17  ;;  %v517_v19 = vmul.f32 -0.00019511016, %v509_v17 }
 0x1a6   : > { %v511_v21 = vadd.f32 0.041655596, %v510_v18  ;;  %v518_v22 = vadd.f32 0.008332121, %v517_v19 }
 0x1a8   : > { %v512_v32 = vmul.f32 %v511_v21, %v509_v17  ;;  %v519_v24 = vmul.f32 %v518_v22, %v509_v17 }
 0x1aa   : > { %v513_v25 = vadd.f32 -0.4999988, %v512_v32  ;;  %v520_v26 = vadd.f32 -0.16666654, %v519_v24 }
 0x1ac   : > { %v514_v29 = vmul.f32 %v513_v25, %v509_v17  ;;  %v521_v30 = vmul.f32 %v520_v26, %v509_v17 }
 0x1ae   : > { %v515_v31 = vadd.f32 1.0, %v514_v29  ;;  %v522_v33 = vadd.f32 1.0, %v521_v30 }
 0x1b0   : > { %v523_v35 = vmul.f32 %v522_v33, %v507_v16  ;;  %v532_v36 = vxor.u32 2147483648, %v515_v31 }
 0x1b2   : > { %v529_v39 = vxor.u32 2147483648, %v523_v35  ;;  %v533_v42 = vsel %vm531_vm0, %v532_v36, %v523_v35 }
 0x1b4   : > { %v530_v41 = vsel %vm528_vm15, %v515_v31, %v529_v39 }
 0x1b5   : > { %v534_v43 = vsel %vm527_vm1, %v530_v41, %v533_v42 }
 0x1b6   : > { %v535_v44 = vsel %vm524_vm2, nan, %v534_v43 }
 0x1b7   : > { %536 = vst [vmem:[%s183_s26] sm:$0xf] %v535_v44 }
 0x1b8   : > { %731 = shalt.err (!%p728_p5)
}
 0x1b9   : > { %639 = dma.vmem_to_hbm [thread:$0]  (%p851_p4), %s552_s27, 64, %s554_s28, %s538_s15  }
 0x1ba PF: > { %p645_p6 = scmp.ge.s32.totalorder %s782_s17, 2  ;;  %s565_s9 = sand.u32 1, %s762_s12  }
 0x1bb   : > { %s566_s10 = scalar_lea.sflag [#allocation3], %s565_s9 }
 0x1bc   : > { %p642_p7 = pnand %p645_p6, %p858_p8 }
 0x1be   : > { %p643_p9 = pneg %p642_p7 }
 0x1c0   : > { %757 = dma.done.wait (%p643_p9), %s566_s10, 64  }
 0x1c1   : > { %759 = vsyncadd (%p643_p9), %s566_s10, 4294967232  ;;  %s16_s17 = sadd.s32 1, %s782_s17   ;;  %s989_s12 = smov %s766_s13 }
 0x1c2   : > { %p13_p10 = scmp.ge.s32.totalorder %s16_s17, 4   ;;  %s990_s13 = smov %s770_s14 }
 0x1c3   : > { %s991_s14 = smov %s864_s25  ;;  %s992_s15 = smov %s778_s16 }
 0x1c4   : > { %s993_s16 = smov %s995_s20  ;;  %15 = sbr.rel (!%p13_p10) target bundleno = 4 (0x4), region = 67 }
 0x1c9   :  { %572 = vsyncpa [#allocation3], 1 }
 0x1ca   :  { %574 = vsyncpa [#allocation3 + $0x1], 1 }

</bundles_post_ra>
